<compile_context>
chip_gen: v7x
topology: tpu7x:2x2x1
jax: 0.10.0
libtpu: 0.0.40
codegen_flags: <defaults>
</compile_context>

<pallas_src>
import functools

import jax
import jax.numpy as jnp
from jax.experimental import pallas as pl
from jax.experimental.pallas import tpu as pltpu

FEAT_DIM = 64            # feat_dim default of State2RotationModule
ROT_DIM = 9              # rotation_head output dim
OUT_DIM = ROT_DIM + 9    # model_output_dim = rotation_dim(9) + 9 = 18
BN_EPS = 1e-5
LEAKY_SLOPE = 0.01       # F.leaky_relu default negative_slope
_MAX_BATCH_TILE = 2048   # rows per grid step when B is large (v5e VMEM-safe)


# ----------------------------------------------------------------------------
# Kernel
# ----------------------------------------------------------------------------
def _s2r_kernel(fp_ref, cd_ref, ne_ref, w9_ref, b_ref, wbig_ref, w2_ref,
                w3_ref, b3_ref, o_ref):
    """Fused State2RotationModule forward for one batch tile.

    fp_ref/cd_ref/ne_ref : (TB, 3)      raw front_point / cut_direction / next_edge_b
    w9_ref               : (9, 64)      folded first-layer weights [pos(3); dir(3); goal(3)]
    b_ref                : (6, 64)      folded biases [pos, dir, goal, merge, r1, r2]
    wbig_ref             : (2, 128, 64) [wmerge, wr1] (BN folded, K=128 each)
    w2_ref               : (64, 64)     wr2 (BN folded)
    w3_ref               : (64, 18)     wr3 padded: cols 0..8 zero, cols 9..17 = rotation
    b3_ref               : (1, 18)      br3 padded the same way
    o_ref                : (TB, 18)     final ac_pred tile (cols 0..8 exactly zero)
    """
    dot = functools.partial(jnp.dot, preferred_element_type=jnp.float32)
    relu = lambda v: jnp.maximum(v, 0.0)
    lrelu = lambda v: jnp.maximum(v, LEAKY_SLOPE * v)  # valid since 0 < slope < 1

    # K=3 "matmuls" as VPU broadcast-FMAs — keeps the MXU out of the K=3 layers.
    def first_layer(x_ref, w_off, bias_row):
        x = x_ref[...]                                 # (TB, 3)
        y = b_ref[bias_row:bias_row + 1, :]            # (1, 64)
        for k in range(3):
            y = y + x[:, k:k + 1] * w9_ref[w_off + k:w_off + k + 1, :]
        return relu(y)

    pos_feat = first_layer(fp_ref, 0, 0)    # position_net(front_point)
    dir_feat = first_layer(cd_ref, 3, 1)    # direction_net(cut_direction)
    goal_feat = first_layer(ne_ref, 6, 2)   # goal_net(next_edge_b)

    # merge_net(concat([pos, goal])) as a single K=128 dot (in-register lane concat).
    pg = jnp.concatenate([pos_feat, goal_feat], axis=-1)         # (TB, 128)
    mid_feat = relu(dot(pg, wbig_ref[0]) + b_ref[3:4, :])

    # rotation_head (head=True): two leaky_relu(bn(linear)) layers + final linear.
    dm = jnp.concatenate([dir_feat, mid_feat], axis=-1)          # (TB, 128)
    h = lrelu(dot(dm, wbig_ref[1]) + b_ref[4:5, :])
    h = lrelu(dot(h, w2_ref[...]) + b_ref[5:6, :])

    # Final linear already padded so the result IS ac_pred: [zeros(9) | rotation(9)].
    o_ref[...] = dot(h, w3_ref[...]) + b3_ref[...]


# ----------------------------------------------------------------------------
# Wrapper
# ----------------------------------------------------------------------------
def fold_params(p):
    """Fold input normalization + eval-mode BN into the linear weights/biases and
    pack everything into the kernel's parameter slabs."""
    sc, sh = p["bn_scale"], p["bn_shift"]      # (6, 64) each
    mean, std = p["mean"], p["std"]            # (3, 3) each

    def fold_first(w, b, ms_row, bn_row):
        # y = ((x - m)/s) @ W + b  ->  x @ (W/s) + (b - (m/s) @ W), then BN affine.
        m, s = mean[ms_row], std[ms_row]                       # (3,)
        w_eff = (w / s[:, None]) * sc[bn_row][None, :]
        b_eff = (b[0] - (m / s) @ w) * sc[bn_row] + sh[bn_row]
        return w_eff, b_eff

    def fold_bn(w, b, bn_row):
        return w * sc[bn_row][None, :], b[0] * sc[bn_row] + sh[bn_row]

    # BN row mapping: 0=pos, 1=goal, 2=dir, 3=merge, 4=r1, 5=r2
    # mean/std rows:  0=front_point(pos), 1=cut_direction(dir), 2=next_edge_b(goal)
    wpos, bpos = fold_first(p["wpos"], p["bpos"], 0, 0)
    wdir, bdir = fold_first(p["wdir"], p["bdir"], 1, 2)
    wgoal, bgoal = fold_first(p["wgoal"], p["bgoal"], 2, 1)
    wmerge, bmerge = fold_bn(p["wmerge"], p["bmerge"], 3)
    wr1, br1 = fold_bn(p["wr1"], p["br1"], 4)
    wr2, br2 = fold_bn(p["wr2"], p["br2"], 5)

    # Final linear padded so rotation lands in lanes 9..17 of the 18-wide output
    # (lanes 0..8 are exact zeros) -> the kernel writes ac_pred directly.
    w3 = jnp.zeros((FEAT_DIM, OUT_DIM), jnp.float32).at[:, ROT_DIM:].set(p["wr3"])
    b3 = jnp.zeros((1, OUT_DIM), jnp.float32).at[0, ROT_DIM:].set(p["br3"][0])

    w9 = jnp.concatenate([wpos, wdir, wgoal], axis=0).astype(jnp.float32)        # (9, 64)
    bias = jnp.stack([bpos, bdir, bgoal, bmerge, br1, br2]).astype(jnp.float32)  # (6, 64)
    wbig = jnp.stack([wmerge, wr1]).astype(jnp.float32)                          # (2, 128, 64)
    return w9, bias, wbig, wr2.astype(jnp.float32), w3, b3


def state2rotation_forward(folded, front_point, cut_direction, next_edge_b):
    w9, bias, wbig, w2, w3, b3 = folded
    B = front_point.shape[0]

    fp = front_point.astype(jnp.float32)
    cd = cut_direction.astype(jnp.float32)
    ne = next_edge_b.astype(jnp.float32)

    # Batch tiling: one step for small/medium batches; for B > 1024 force >= 2 grid
    # steps (v7x has two TensorCores) and cap the tile at 2048 rows (v5e VMEM-safe).
    # Ragged last blocks are handled by Pallas (rows are independent), so no padding
    # copy is needed on the wrapper side.
    if B <= 1024:
        tile = B
    else:
        half8 = ((((B + 1) // 2) + 7) // 8) * 8
        tile = min(_MAX_BATCH_TILE, half8)
    grid = (pl.cdiv(B, tile),)

    out = pl.pallas_call(
        _s2r_kernel,
        out_shape=jax.ShapeDtypeStruct((B, OUT_DIM), jnp.float32),
        grid=grid,
        in_specs=[
            pl.BlockSpec((tile, 3), lambda i: (i, 0)),                   # front_point
            pl.BlockSpec((tile, 3), lambda i: (i, 0)),                   # cut_direction
            pl.BlockSpec((tile, 3), lambda i: (i, 0)),                   # next_edge_b
            pl.BlockSpec((9, FEAT_DIM), lambda i: (0, 0)),               # resident
            pl.BlockSpec((6, FEAT_DIM), lambda i: (0, 0)),               # resident
            pl.BlockSpec((2, 2 * FEAT_DIM, FEAT_DIM), lambda i: (0, 0, 0)),  # resident
            pl.BlockSpec((FEAT_DIM, FEAT_DIM), lambda i: (0, 0)),        # resident
            pl.BlockSpec((FEAT_DIM, OUT_DIM), lambda i: (0, 0)),         # resident
            pl.BlockSpec((1, OUT_DIM), lambda i: (0, 0)),                # resident
        ],
        out_specs=pl.BlockSpec((tile, OUT_DIM), lambda i: (i, 0)),
        compiler_params=pltpu.CompilerParams(
            dimension_semantics=("parallel",),        # megacore-shardable batch axis
            vmem_limit_bytes=32 * 1024 * 1024),       # headroom over v5e's 16 MiB default
    )(fp, cd, ne, w9, bias, wbig, w2, w3, b3)

    return out


# ----------------------------------------------------------------------------
# Parameter construction (PyTorch-default initialization, eval-mode BN)
# ----------------------------------------------------------------------------
def _linear_init(key, fan_in, fan_out):
    # PyTorch nn.Linear default: U(-1/sqrt(fan_in), 1/sqrt(fan_in)) for W and b.
    kw, kb = jax.random.split(key)
    bound = 1.0 / jnp.sqrt(float(fan_in))
    w = jax.random.uniform(kw, (fan_in, fan_out), jnp.float32, -bound, bound)
    b = jax.random.uniform(kb, (1, fan_out), jnp.float32, -bound, bound)
    return w, b


def make_params(key, feat_dim=FEAT_DIM):
    keys = jax.random.split(key, 7)
    wpos, bpos = _linear_init(keys[0], 3, feat_dim)
    wgoal, bgoal = _linear_init(keys[1], 3, feat_dim)
    wdir, bdir = _linear_init(keys[2], 3, feat_dim)
    wmerge, bmerge = _linear_init(keys[3], 2 * feat_dim, feat_dim)
    wr1, br1 = _linear_init(keys[4], 2 * feat_dim, feat_dim)
    wr2, br2 = _linear_init(keys[5], feat_dim, feat_dim)
    wr3, br3 = _linear_init(keys[6], feat_dim, ROT_DIM)

    # BatchNorm1d eval-mode fold: scale = gamma/sqrt(var+eps), shift = beta - mean*scale
    # (default init: gamma=1, beta=0, running_mean=0, running_var=1)
    bn_scale = jnp.full((6, feat_dim), 1.0 / jnp.sqrt(1.0 + BN_EPS), jnp.float32)
    bn_shift = jnp.zeros((6, feat_dim), jnp.float32)

    # input_statistics (deterministic synthetic values); rows:
    # 0 = front_point, 1 = cut_direction, 2 = next_edge['b']
    mean = jnp.array([[0.10, -0.20, 0.05],
                      [0.00, 0.00, 0.00],
                      [-0.05, 0.15, 0.25]], jnp.float32)
    std = jnp.array([[0.50, 0.75, 1.25],
                     [1.00, 1.00, 1.00],
                     [0.80, 1.10, 0.60]], jnp.float32)

    return dict(mean=mean, std=std,
                wpos=wpos, bpos=bpos, wgoal=wgoal, bgoal=bgoal,
                wdir=wdir, bdir=bdir, wmerge=wmerge, bmerge=bmerge,
                wr1=wr1, br1=br1, wr2=wr2, br2=br2, wr3=wr3, br3=br3,
                bn_scale=bn_scale, bn_shift=bn_shift)


def reference_forward(p, fp, cd, ne):
    """Pure-JAX reference mirroring the PyTorch forward (eval-mode BN), unfolded."""
    relu = lambda x: jnp.maximum(x, 0.0)
    lrelu = lambda x: jnp.where(x >= 0.0, x, LEAKY_SLOPE * x)
    bn = lambda x, i: x * p["bn_scale"][i:i + 1] + p["bn_shift"][i:i + 1]
    fp = (fp - p["mean"][0:1]) / p["std"][0:1]
    cd = (cd - p["mean"][1:2]) / p["std"][1:2]
    ne = (ne - p["mean"][2:3]) / p["std"][2:3]
    pos = relu(bn(fp @ p["wpos"] + p["bpos"], 0))
    goal = relu(bn(ne @ p["wgoal"] + p["bgoal"], 1))
    dirf = relu(bn(cd @ p["wdir"] + p["bdir"], 2))
    mid = relu(bn(jnp.concatenate([pos, goal], -1) @ p["wmerge"] + p["bmerge"], 3))
    h = jnp.concatenate([dirf, mid], -1)
    h = lrelu(bn(h @ p["wr1"] + p["br1"], 4))
    h = lrelu(bn(h @ p["wr2"] + p["br2"], 5))
    rot = h @ p["wr3"] + p["br3"]
    return jnp.concatenate([jnp.zeros((fp.shape[0], 9), jnp.float32), rot], -1)


if __name__ == "__main__":
    key = jax.random.PRNGKey(0)
    kparam, kfp, kcd, kne = jax.random.split(key, 4)

    B = 8
    params = make_params(kparam)
    folded = fold_params(params)   # fold once, reuse across forward calls

    front_point = jax.random.normal(kfp, (B, 3), jnp.float32)
    cut_direction = jax.random.normal(kcd, (B, 3), jnp.float32)
    next_edge_b = jax.random.normal(kne, (B, 3), jnp.float32)

    out = state2rotation_forward(folded, front_point, cut_direction, next_edge_b)
    out = jax.block_until_ready(out)

    ref = reference_forward(params, front_point, cut_direction, next_edge_b)
    assert out.shape == (B, OUT_DIM), out.shape
    assert jnp.allclose(out, ref, atol=1e-4, rtol=1e-4), "mismatch vs JAX reference"
    assert jnp.all(out[:, :ROT_DIM] == 0.0), "left zero block not zero"

    print("KERNEL_OK")
</pallas_src>

<mosaic_0001>
module attributes {stable_mosaic.version = 11 : i64} {
  func.func @_s2r_kernel(%arg0: i32, %arg1: memref<8x3xf32, #tpu.memory_space<vmem>>, %arg2: memref<8x3xf32, #tpu.memory_space<vmem>>, %arg3: memref<8x3xf32, #tpu.memory_space<vmem>>, %arg4: memref<9x64xf32, #tpu.memory_space<vmem>>, %arg5: memref<6x64xf32, #tpu.memory_space<vmem>>, %arg6: memref<2x128x64xf32, #tpu.memory_space<vmem>>, %arg7: memref<64x64xf32, #tpu.memory_space<vmem>>, %arg8: memref<64x18xf32, #tpu.memory_space<vmem>>, %arg9: memref<1x18xf32, #tpu.memory_space<vmem>>, %arg10: memref<8x18xf32, #tpu.memory_space<vmem>>) attributes {dimension_semantics = [#tpu.dimension_semantics<parallel>], iteration_bounds = array<i64: 1>, scalar_prefetch = 0 : i64, scratch_operands = 0 : i64, tpu.core_type = #tpu.core_type<tc>, window_params = [{transform_indices = @transform_0, window_bounds = array<i64: 8, 3>}, {transform_indices = @transform_1, window_bounds = array<i64: 8, 3>}, {transform_indices = @transform_2, window_bounds = array<i64: 8, 3>}, {pipeline_mode = #tpu.pipeline_mode<synchronous>, transform_indices = @transform_3, window_bounds = array<i64: 9, 64>}, {pipeline_mode = #tpu.pipeline_mode<synchronous>, transform_indices = @transform_4, window_bounds = array<i64: 6, 64>}, {pipeline_mode = #tpu.pipeline_mode<synchronous>, transform_indices = @transform_5, window_bounds = array<i64: 2, 128, 64>}, {pipeline_mode = #tpu.pipeline_mode<synchronous>, transform_indices = @transform_6, window_bounds = array<i64: 64, 64>}, {pipeline_mode = #tpu.pipeline_mode<synchronous>, transform_indices = @transform_7, window_bounds = array<i64: 64, 18>}, {pipeline_mode = #tpu.pipeline_mode<synchronous>, transform_indices = @transform_8, window_bounds = array<i64: 1, 18>}, {transform_indices = @transform_9, window_bounds = array<i64: 8, 18>}]} {
    %c0 = arith.constant 0 : index
    %c0_0 = arith.constant 0 : index
    %0 = vector.load %arg1[%c0, %c0_0] : memref<8x3xf32, #tpu.memory_space<vmem>>, vector<8x3xf32>
    %c0_1 = arith.constant 0 : index
    %c0_2 = arith.constant 0 : index
    %1 = vector.load %arg5[%c0_1, %c0_2] : memref<6x64xf32, #tpu.memory_space<vmem>>, vector<1x64xf32>
    %2 = vector.extract_strided_slice %0 {offsets = [0, 0], sizes = [8, 1], strides = [1, 1]} : vector<8x3xf32> to vector<8x1xf32>
    %c0_3 = arith.constant 0 : index
    %c0_4 = arith.constant 0 : index
    %3 = vector.load %arg4[%c0_3, %c0_4] : memref<9x64xf32, #tpu.memory_space<vmem>>, vector<1x64xf32>
    %4 = vector.broadcast %2 : vector<8x1xf32> to vector<8x64xf32>
    %5 = vector.broadcast %3 : vector<1x64xf32> to vector<8x64xf32>
    %6 = arith.mulf %4, %5 : vector<8x64xf32>
    %7 = vector.broadcast %1 : vector<1x64xf32> to vector<8x64xf32>
    %8 = arith.addf %7, %6 : vector<8x64xf32>
    %9 = vector.extract_strided_slice %0 {offsets = [0, 1], sizes = [8, 1], strides = [1, 1]} : vector<8x3xf32> to vector<8x1xf32>
    %c1 = arith.constant 1 : index
    %c0_5 = arith.constant 0 : index
    %10 = vector.load %arg4[%c1, %c0_5] : memref<9x64xf32, #tpu.memory_space<vmem>>, vector<1x64xf32>
    %11 = vector.broadcast %9 : vector<8x1xf32> to vector<8x64xf32>
    %12 = vector.broadcast %10 : vector<1x64xf32> to vector<8x64xf32>
    %13 = arith.mulf %11, %12 : vector<8x64xf32>
    %14 = arith.addf %8, %13 : vector<8x64xf32>
    %15 = vector.extract_strided_slice %0 {offsets = [0, 2], sizes = [8, 1], strides = [1, 1]} : vector<8x3xf32> to vector<8x1xf32>
    %c2 = arith.constant 2 : index
    %c0_6 = arith.constant 0 : index
    %16 = vector.load %arg4[%c2, %c0_6] : memref<9x64xf32, #tpu.memory_space<vmem>>, vector<1x64xf32>
    %17 = vector.broadcast %15 : vector<8x1xf32> to vector<8x64xf32>
    %18 = vector.broadcast %16 : vector<1x64xf32> to vector<8x64xf32>
    %19 = arith.mulf %17, %18 : vector<8x64xf32>
    %20 = arith.addf %14, %19 : vector<8x64xf32>
    %cst = arith.constant 0.000000e+00 : f32
    %21 = vector.broadcast %cst : f32 to vector<8x64xf32>
    %22 = arith.maximumf %20, %21 : vector<8x64xf32>
    %c0_7 = arith.constant 0 : index
    %c0_8 = arith.constant 0 : index
    %23 = vector.load %arg2[%c0_7, %c0_8] : memref<8x3xf32, #tpu.memory_space<vmem>>, vector<8x3xf32>
    %c1_9 = arith.constant 1 : index
    %c0_10 = arith.constant 0 : index
    %24 = vector.load %arg5[%c1_9, %c0_10] : memref<6x64xf32, #tpu.memory_space<vmem>>, vector<1x64xf32>
    %25 = vector.extract_strided_slice %23 {offsets = [0, 0], sizes = [8, 1], strides = [1, 1]} : vector<8x3xf32> to vector<8x1xf32>
    %c3 = arith.constant 3 : index
    %c0_11 = arith.constant 0 : index
    %26 = vector.load %arg4[%c3, %c0_11] : memref<9x64xf32, #tpu.memory_space<vmem>>, vector<1x64xf32>
    %27 = vector.broadcast %25 : vector<8x1xf32> to vector<8x64xf32>
    %28 = vector.broadcast %26 : vector<1x64xf32> to vector<8x64xf32>
    %29 = arith.mulf %27, %28 : vector<8x64xf32>
    %30 = vector.broadcast %24 : vector<1x64xf32> to vector<8x64xf32>
    %31 = arith.addf %30, %29 : vector<8x64xf32>
    %32 = vector.extract_strided_slice %23 {offsets = [0, 1], sizes = [8, 1], strides = [1, 1]} : vector<8x3xf32> to vector<8x1xf32>
    %c4 = arith.constant 4 : index
    %c0_12 = arith.constant 0 : index
    %33 = vector.load %arg4[%c4, %c0_12] : memref<9x64xf32, #tpu.memory_space<vmem>>, vector<1x64xf32>
    %34 = vector.broadcast %32 : vector<8x1xf32> to vector<8x64xf32>
    %35 = vector.broadcast %33 : vector<1x64xf32> to vector<8x64xf32>
    %36 = arith.mulf %34, %35 : vector<8x64xf32>
    %37 = arith.addf %31, %36 : vector<8x64xf32>
    %38 = vector.extract_strided_slice %23 {offsets = [0, 2], sizes = [8, 1], strides = [1, 1]} : vector<8x3xf32> to vector<8x1xf32>
    %c5 = arith.constant 5 : index
    %c0_13 = arith.constant 0 : index
    %39 = vector.load %arg4[%c5, %c0_13] : memref<9x64xf32, #tpu.memory_space<vmem>>, vector<1x64xf32>
    %40 = vector.broadcast %38 : vector<8x1xf32> to vector<8x64xf32>
    %41 = vector.broadcast %39 : vector<1x64xf32> to vector<8x64xf32>
    %42 = arith.mulf %40, %41 : vector<8x64xf32>
    %43 = arith.addf %37, %42 : vector<8x64xf32>
    %cst_14 = arith.constant 0.000000e+00 : f32
    %44 = vector.broadcast %cst_14 : f32 to vector<8x64xf32>
    %45 = arith.maximumf %43, %44 : vector<8x64xf32>
    %c0_15 = arith.constant 0 : index
    %c0_16 = arith.constant 0 : index
    %46 = vector.load %arg3[%c0_15, %c0_16] : memref<8x3xf32, #tpu.memory_space<vmem>>, vector<8x3xf32>
    %c2_17 = arith.constant 2 : index
    %c0_18 = arith.constant 0 : index
    %47 = vector.load %arg5[%c2_17, %c0_18] : memref<6x64xf32, #tpu.memory_space<vmem>>, vector<1x64xf32>
    %48 = vector.extract_strided_slice %46 {offsets = [0, 0], sizes = [8, 1], strides = [1, 1]} : vector<8x3xf32> to vector<8x1xf32>
    %c6 = arith.constant 6 : index
    %c0_19 = arith.constant 0 : index
    %49 = vector.load %arg4[%c6, %c0_19] : memref<9x64xf32, #tpu.memory_space<vmem>>, vector<1x64xf32>
    %50 = vector.broadcast %48 : vector<8x1xf32> to vector<8x64xf32>
    %51 = vector.broadcast %49 : vector<1x64xf32> to vector<8x64xf32>
    %52 = arith.mulf %50, %51 : vector<8x64xf32>
    %53 = vector.broadcast %47 : vector<1x64xf32> to vector<8x64xf32>
    %54 = arith.addf %53, %52 : vector<8x64xf32>
    %55 = vector.extract_strided_slice %46 {offsets = [0, 1], sizes = [8, 1], strides = [1, 1]} : vector<8x3xf32> to vector<8x1xf32>
    %c7 = arith.constant 7 : index
    %c0_20 = arith.constant 0 : index
    %56 = vector.load %arg4[%c7, %c0_20] : memref<9x64xf32, #tpu.memory_space<vmem>>, vector<1x64xf32>
    %57 = vector.broadcast %55 : vector<8x1xf32> to vector<8x64xf32>
    %58 = vector.broadcast %56 : vector<1x64xf32> to vector<8x64xf32>
    %59 = arith.mulf %57, %58 : vector<8x64xf32>
    %60 = arith.addf %54, %59 : vector<8x64xf32>
    %61 = vector.extract_strided_slice %46 {offsets = [0, 2], sizes = [8, 1], strides = [1, 1]} : vector<8x3xf32> to vector<8x1xf32>
    %c8 = arith.constant 8 : index
    %c0_21 = arith.constant 0 : index
    %62 = vector.load %arg4[%c8, %c0_21] : memref<9x64xf32, #tpu.memory_space<vmem>>, vector<1x64xf32>
    %63 = vector.broadcast %61 : vector<8x1xf32> to vector<8x64xf32>
    %64 = vector.broadcast %62 : vector<1x64xf32> to vector<8x64xf32>
    %65 = arith.mulf %63, %64 : vector<8x64xf32>
    %66 = arith.addf %60, %65 : vector<8x64xf32>
    %cst_22 = arith.constant 0.000000e+00 : f32
    %67 = vector.broadcast %cst_22 : f32 to vector<8x64xf32>
    %68 = arith.maximumf %66, %67 : vector<8x64xf32>
    %69 = tpu.concatenate %22, %68 in 1 : vector<8x64xf32>, vector<8x64xf32> -> vector<8x128xf32>
    %c0_23 = arith.constant 0 : index
    %c0_24 = arith.constant 0 : index
    %c0_25 = arith.constant 0 : index
    %70 = vector.load %arg6[%c0_23, %c0_24, %c0_25] : memref<2x128x64xf32, #tpu.memory_space<vmem>>, vector<1x128x64xf32>
    %71 = vector.shape_cast %70 : vector<1x128x64xf32> to vector<128x64xf32>
    %cst_26 = arith.constant dense<0.000000e+00> : vector<8x64xf32>
    %72 = tpu.matmul %69, %71, %cst_26 {dimension_numbers = #tpu.dot_dimension_numbers<[1], [0], [0], [1], [0, 0, 1, 1], [], []>} : vector<8x128xf32>, vector<128x64xf32>, vector<8x64xf32> -> vector<8x64xf32>
    %c3_27 = arith.constant 3 : index
    %c0_28 = arith.constant 0 : index
    %73 = vector.load %arg5[%c3_27, %c0_28] : memref<6x64xf32, #tpu.memory_space<vmem>>, vector<1x64xf32>
    %74 = vector.broadcast %73 : vector<1x64xf32> to vector<8x64xf32>
    %75 = arith.addf %72, %74 : vector<8x64xf32>
    %cst_29 = arith.constant 0.000000e+00 : f32
    %76 = vector.broadcast %cst_29 : f32 to vector<8x64xf32>
    %77 = arith.maximumf %75, %76 : vector<8x64xf32>
    %78 = tpu.concatenate %45, %77 in 1 : vector<8x64xf32>, vector<8x64xf32> -> vector<8x128xf32>
    %c1_30 = arith.constant 1 : index
    %c0_31 = arith.constant 0 : index
    %c0_32 = arith.constant 0 : index
    %79 = vector.load %arg6[%c1_30, %c0_31, %c0_32] : memref<2x128x64xf32, #tpu.memory_space<vmem>>, vector<1x128x64xf32>
    %80 = vector.shape_cast %79 : vector<1x128x64xf32> to vector<128x64xf32>
    %cst_33 = arith.constant dense<0.000000e+00> : vector<8x64xf32>
    %81 = tpu.matmul %78, %80, %cst_33 {dimension_numbers = #tpu.dot_dimension_numbers<[1], [0], [0], [1], [0, 0, 1, 1], [], []>} : vector<8x128xf32>, vector<128x64xf32>, vector<8x64xf32> -> vector<8x64xf32>
    %c4_34 = arith.constant 4 : index
    %c0_35 = arith.constant 0 : index
    %82 = vector.load %arg5[%c4_34, %c0_35] : memref<6x64xf32, #tpu.memory_space<vmem>>, vector<1x64xf32>
    %83 = vector.broadcast %82 : vector<1x64xf32> to vector<8x64xf32>
    %84 = arith.addf %81, %83 : vector<8x64xf32>
    %cst_36 = arith.constant 0.00999999977 : f32
    %85 = vector.broadcast %cst_36 : f32 to vector<8x64xf32>
    %86 = arith.mulf %85, %84 : vector<8x64xf32>
    %87 = arith.maximumf %84, %86 : vector<8x64xf32>
    %c0_37 = arith.constant 0 : index
    %c0_38 = arith.constant 0 : index
    %88 = vector.load %arg7[%c0_37, %c0_38] : memref<64x64xf32, #tpu.memory_space<vmem>>, vector<64x64xf32>
    %cst_39 = arith.constant dense<0.000000e+00> : vector<8x64xf32>
    %89 = tpu.matmul %87, %88, %cst_39 {dimension_numbers = #tpu.dot_dimension_numbers<[1], [0], [0], [1], [0, 0, 1, 1], [], []>} : vector<8x64xf32>, vector<64x64xf32>, vector<8x64xf32> -> vector<8x64xf32>
    %c5_40 = arith.constant 5 : index
    %c0_41 = arith.constant 0 : index
    %90 = vector.load %arg5[%c5_40, %c0_41] : memref<6x64xf32, #tpu.memory_space<vmem>>, vector<1x64xf32>
    %91 = vector.broadcast %90 : vector<1x64xf32> to vector<8x64xf32>
    %92 = arith.addf %89, %91 : vector<8x64xf32>
    %cst_42 = arith.constant 0.00999999977 : f32
    %93 = vector.broadcast %cst_42 : f32 to vector<8x64xf32>
    %94 = arith.mulf %93, %92 : vector<8x64xf32>
    %95 = arith.maximumf %92, %94 : vector<8x64xf32>
    %c0_43 = arith.constant 0 : index
    %c0_44 = arith.constant 0 : index
    %96 = vector.load %arg8[%c0_43, %c0_44] : memref<64x18xf32, #tpu.memory_space<vmem>>, vector<64x18xf32>
    %cst_45 = arith.constant dense<0.000000e+00> : vector<8x18xf32>
    %97 = tpu.matmul %95, %96, %cst_45 {dimension_numbers = #tpu.dot_dimension_numbers<[1], [0], [0], [1], [0, 0, 1, 1], [], []>} : vector<8x64xf32>, vector<64x18xf32>, vector<8x18xf32> -> vector<8x18xf32>
    %c0_46 = arith.constant 0 : index
    %c0_47 = arith.constant 0 : index
    %98 = vector.load %arg9[%c0_46, %c0_47] : memref<1x18xf32, #tpu.memory_space<vmem>>, vector<1x18xf32>
    %99 = vector.broadcast %98 : vector<1x18xf32> to vector<8x18xf32>
    %100 = arith.addf %97, %99 : vector<8x18xf32>
    %c0_48 = arith.constant 0 : index
    %c0_49 = arith.constant 0 : index
    %101 = vector.load %arg10[%c0_48, %c0_49] : memref<8x18xf32, #tpu.memory_space<vmem>>, vector<8x18xf32>
    tpu.vector_store %arg10[%c0_48, %c0_49], %100 {strides = array<i32>} : memref<8x18xf32, #tpu.memory_space<vmem>>, vector<8x18xf32>,
    return
  }
  func.func @transform_0(%arg0: i32) -> (i32, i32) {
    %c0_i32 = arith.constant 0 : i32
    %c0_i32_0 = arith.constant 0 : i32
    return %arg0, %c0_i32 : i32, i32
  }
  func.func @transform_1(%arg0: i32) -> (i32, i32) {
    %c0_i32 = arith.constant 0 : i32
    %c0_i32_0 = arith.constant 0 : i32
    return %arg0, %c0_i32 : i32, i32
  }
  func.func @transform_2(%arg0: i32) -> (i32, i32) {
    %c0_i32 = arith.constant 0 : i32
    %c0_i32_0 = arith.constant 0 : i32
    return %arg0, %c0_i32 : i32, i32
  }
  func.func @transform_3(%arg0: i32) -> (i32, i32) {
    %c0_i32 = arith.constant 0 : i32
    %c0_i32_0 = arith.constant 0 : i32
    %c0_i32_1 = arith.constant 0 : i32
    return %c0_i32, %c0_i32_0 : i32, i32
  }
  func.func @transform_4(%arg0: i32) -> (i32, i32) {
    %c0_i32 = arith.constant 0 : i32
    %c0_i32_0 = arith.constant 0 : i32
    %c0_i32_1 = arith.constant 0 : i32
    return %c0_i32, %c0_i32_0 : i32, i32
  }
  func.func @transform_5(%arg0: i32) -> (i32, i32, i32) {
    %c0_i32 = arith.constant 0 : i32
    %c0_i32_0 = arith.constant 0 : i32
    %c0_i32_1 = arith.constant 0 : i32
    %c0_i32_2 = arith.constant 0 : i32
    return %c0_i32, %c0_i32_0, %c0_i32_1 : i32, i32, i32
  }
  func.func @transform_6(%arg0: i32) -> (i32, i32) {
    %c0_i32 = arith.constant 0 : i32
    %c0_i32_0 = arith.constant 0 : i32
    %c0_i32_1 = arith.constant 0 : i32
    return %c0_i32, %c0_i32_0 : i32, i32
  }
  func.func @transform_7(%arg0: i32) -> (i32, i32) {
    %c0_i32 = arith.constant 0 : i32
    %c0_i32_0 = arith.constant 0 : i32
    %c0_i32_1 = arith.constant 0 : i32
    return %c0_i32, %c0_i32_0 : i32, i32
  }
  func.func @transform_8(%arg0: i32) -> (i32, i32) {
    %c0_i32 = arith.constant 0 : i32
    %c0_i32_0 = arith.constant 0 : i32
    %c0_i32_1 = arith.constant 0 : i32
    return %c0_i32, %c0_i32_0 : i32, i32
  }
  func.func @transform_9(%arg0: i32) -> (i32, i32) {
    %c0_i32 = arith.constant 0 : i32
    %c0_i32_0 = arith.constant 0 : i32
    return %arg0, %c0_i32 : i32, i32
  }
}

</mosaic_0001>

<bundles_post_ra>
// kernel: tpu_custom_call.1
= control target key start
LH: loop header
LB: loop body
LE: loop exit
PB: predicated region body
PF: predicated region fallthrough
CT: control target
= control target key end

     0   :  { %v853_v1 = vmov 0   ;;  %v854_v2 = vmov 2   ;;  %s1166_s0 = inlined_call_operand.vmem [shape: f32[8,3], index: 0, kind: input, shape index: {}]   ;;  %s1167_s1 = inlined_call_operand.vmem [shape: f32[8,3], index: 1, kind: input, shape index: {}]   ;;  %s1168_s2 = inlined_call_operand.vmem [shape: f32[8,3], index: 2, kind: input, shape index: {}]   ;;  %s1169_s3 = inlined_call_operand.vmem [shape: f32[9,64], index: 3, kind: input, shape index: {}]   ;;  %s1170_s4 = inlined_call_operand.vmem [shape: f32[6,64], index: 4, kind: input, shape index: {}]   ;;  %s1171_s5 = inlined_call_operand.vmem [shape: f32[2,128,64], index: 5, kind: input, shape index: {}]   ;;  %s1172_s6 = inlined_call_operand.vmem [shape: f32[64,64], index: 6, kind: input, shape index: {}]   ;;  %s1173_s7 = inlined_call_operand.vmem [shape: f32[64,18], index: 7, kind: input, shape index: {}]   ;;  %s1174_s8 = inlined_call_operand.vmem [shape: f32[1,18], index: 8, kind: input, shape index: {}]   ;;  %s1175_s9 = inlined_call_operand.hbm [shape: f32[8,18], index: 9, kind: output, shape index: {}]  }
   0x1   :  { %v115_v0 = vld [vmem:[%s1168_s2] sm:$0xff]  ;;  %819 = vset.pattern.permute.xlu0 %v853_v1  ;;  %821 = vset.pattern.permute.xlu1 %v854_v2 }
   0x2   :  { %14 = vsyncpa [#allocation3], 0  ;;  %120 = vperm.xlu0 %819, %v115_v0   ;;  %146 = vperm.xlu1 %821, %v115_v0   ;;  %v33_v3 = vld [vmem:[%s1166_s0] sm:$0xff]  ;;  %v855_v4 = vmov 1   ;;  %v163_v6 = vld [vmem:[%s1171_s5 + $0x8] sm:$0xff]  ;;  %v856_v8 = vmov 0.0|0.0  }
   0x3   :  { %v162_v5 = vld [vmem:[%s1171_s5] sm:$0xff]  ;;  %v164_v7 = vld [vmem:[%s1171_s5 + $0x10] sm:$0xff]  ;;  %739 = vmatprep.subr.bf16.mxu0 %v856_v8  ;;  %v165_v10 = vld [vmem:[%s1171_s5 + $0x18] sm:$0xff]  ;;  %763 = vmatprep.subr.bf16.mxu1 %v856_v8  ;;  %vm857_vm0 = vmmov 0   ;;  %v858_v32 = vmov 0.0   ;;  %vm160_vm1 = vcmask 523264  }
   0x4   :  { %v740_v9 = vpack.c.bf16 %v163_v6, %v162_v5  ;;  %v743_v11 = vpack.c.bf16 %v165_v10, %v164_v7  ;;  %v166_v12 = vld [vmem:[%s1171_s5 + $0x20] sm:$0xff]  ;;  %v167_v13 = vld [vmem:[%s1171_s5 + $0x28] sm:$0xff]  ;;  %v168_v15 = vld [vmem:[%s1171_s5 + $0x30] sm:$0xff]  ;;  %663 = vmatprep.mubr.msk.f32.mxu0 %vm857_vm0, %v858_v32  ;;  %698 = vmatprep.mubr.msk.f32.mxu1 %vm857_vm0, %v858_v32  ;;  %s860_s20 = smov [#allocation2]   ;;  %vm529_vm2 = vcmask 146432  }
   0x5   :  { %v746_v14 = vpack.c.bf16 %v167_v13, %v166_v12  ;;  %v169_v16 = vld [vmem:[%s1171_s5 + $0x38] sm:$0xff]  ;;  %v170_v18 = vld [vmem:[%s1171_s5 + $0x40] sm:$0xff]  ;;  %v171_v19 = vld [vmem:[%s1171_s5 + $0x48] sm:$0xff] }
   0x6   :  { %820 = vset.pattern.permute.xlu0 %v855_v4  ;;  %822 = vset.pattern.permute.xlu1 %v853_v1  ;;  %v749_v17 = vpack.c.bf16 %v169_v16, %v168_v15  ;;  %v752_v20 = vpack.c.bf16 %v171_v19, %v170_v18  ;;  %v172_v21 = vld [vmem:[%s1171_s5 + $0x50] sm:$0xff]  ;;  %v173_v22 = vld [vmem:[%s1171_s5 + $0x58] sm:$0xff]  ;;  %v174_v24 = vld [vmem:[%s1171_s5 + $0x60] sm:$0xff] }
   0x7   :  { %135 = vperm.xlu0 %820, %v115_v0   ;;  %38 = vperm.xlu1 %822, %v33_v3   ;;  %v755_v23 = vpack.c.bf16 %v173_v22, %v172_v21  ;;  %v175_v25 = vld [vmem:[%s1171_s5 + $0x68] sm:$0xff]  ;;  %v176_v27 = vld [vmem:[%s1171_s5 + $0x70] sm:$0xff]  ;;  %v177_v28 = vld [vmem:[%s1171_s5 + $0x78] sm:$0xff] }
   0x8   :  { %741 = vmatpush3.bf16.msra.mxu0 %v740_v9  ;;  %v758_v26 = vpack.c.bf16 %v175_v25, %v174_v24  ;;  %v761_v29 = vpack.c.bf16 %v177_v28, %v176_v27  ;;  %v553_v30 = vld [vmem:[%s1169_s3 + $0x6] ss:$0 sm:$0xff]  ;;  %v554_v35 = vld [vmem:[%s1170_s4 + $0x2] ss:$0 sm:$0xff]  ;;  %v555_v36 = vld [vmem:[%s1169_s3 + $0x7] ss:$0 sm:$0xff] }
   0x9   :  { %742 = vmatprep.subr.bf16.mxu0 %v856_v8  ;;  %v74_v34 = vld [vmem:[%s1167_s1] sm:$0xff]  ;;  %v556_v37 = vld [vmem:[%s1169_s3 + $0x8] ss:$0 sm:$0xff]  ;;  %s859_s1 = smov 64   ;;  %v560_v0 = vld [vmem:[%s1171_s5 + $0x90] sm:$0xff] }
   0xa   :  { %v545_v47 = vld [vmem:[%s1169_s3] ss:$0 sm:$0xff]  ;;  %v547_v50 = vld [vmem:[%s1169_s3 + $0x1] ss:$0 sm:$0xff]  ;;  %v548_v54 = vld [vmem:[%s1169_s3 + $0x2] ss:$0 sm:$0xff] }
   0xb   :  { %823 = vset.pattern.permute.xlu1 %v855_v4  ;;  %824 = vset.pattern.permute.xlu0 %v854_v2  ;;  %v546_v49 = vld [vmem:[%s1170_s4] ss:$0 sm:$0xff]  ;;  %v559_v63 = vld [vmem:[%s1171_s5 + $0x88] sm:$0xff]  ;;  %v564_v7 = vld [vmem:[%s1171_s5 + $0xb0] sm:$0xff] }
   0xc   :  { %53 = vperm.xlu1 %823, %v33_v3   ;;  %64 = vperm.xlu0 %824, %v33_v3   ;;  %v558_v62 = vld [vmem:[%s1171_s5 + $0x80] sm:$0xff]  ;;  %v563_v5 = vld [vmem:[%s1171_s5 + $0xa8] sm:$0xff]  ;;  %v565_v9 = vld [vmem:[%s1171_s5 + $0xb8] sm:$0xff] }
   0xd   :  { %744 = vmatpush3.bf16.msra.mxu0 %v743_v11  ;;  %v773_v10 = vpack.c.bf16 %v565_v9, %v564_v7  ;;  %v566_v11 = vld [vmem:[%s1171_s5 + $0xc0] sm:$0xff]  ;;  %v567_v12 = vld [vmem:[%s1171_s5 + $0xc8] sm:$0xff]  ;;  %v569_v15 = vld [vmem:[%s1171_s5 + $0xd8] sm:$0xff] }
   0xe   :  { %745 = vmatprep.subr.bf16.mxu0 %v856_v8  ;;  %v776_v13 = vpack.c.bf16 %v567_v12, %v566_v11  ;;  %v571_v18 = vld [vmem:[%s1171_s5 + $0xe8] sm:$0xff]  ;;  %v573_v21 = vld [vmem:[%s1171_s5 + $0xf8] sm:$0xff]  ;;  %v355_v25 = vld [vmem:[%s1172_s6 + $0x10] sm:$0xff] }
   0xf   :  { %v354_v24 = vld [vmem:[%s1172_s6 + $0x8] sm:$0xff]  ;;  %v356_v27 = vld [vmem:[%s1172_s6 + $0x18] sm:$0xff]  ;;  %v447_v7 = vld [vmem:[%s1173_s7 + $0x30] sm:$0xff] }
  0x10   :  { %825 = vset.pattern.permute.xlu1 %v853_v1  ;;  %826 = vset.pattern.permute.xlu0 %v855_v4  ;;  %v764_v1 = vpack.c.bf16 %v559_v63, %v558_v62  ;;  %v562_v4 = vld [vmem:[%s1171_s5 + $0xa0] sm:$0xff]  ;;  %v791_v28 = vpack.c.bf16 %v356_v27, %v355_v25  ;;  %v448_v9 = vld [vmem:[%s1173_s7 + $0x38] sm:$0xff] }
  0x11   :  { %747 = vmatpush3.bf16.msra.mxu0 %v746_v14  ;;  %94 = vperm.xlu0 %826, %v74_v34   ;;  %v770_v6 = vpack.c.bf16 %v563_v5, %v562_v4  ;;  %v568_v14 = vld [vmem:[%s1171_s5 + $0xd0] sm:$0xff]  ;;  %v574_v62 = vld [vmem:[%s1170_s4 + $0x4] ss:$0 sm:$0xff]  ;;  %v446_v5 = vld [vmem:[%s1173_s7 + $0x28] sm:$0xff] }
  0x12   :  { %748 = vmatprep.subr.bf16.mxu0 %v856_v8  ;;  %765 = vmatpush3.bf16.msra.mxu1 %v764_v1  ;;  %v779_v16 = vpack.c.bf16 %v569_v15, %v568_v14  ;;  %v445_v4 = vld [vmem:[%s1173_s7 + $0x20] sm:$0xff] }
  0x13   :  { %766 = vmatprep.subr.bf16.mxu1 %v856_v8  ;;  %v575_v11 = vld [vmem:[%s1170_s4 + $0x5] ss:$0 sm:$0xff] }
  0x15   :  { %750 = vmatpush3.bf16.msra.mxu0 %v749_v17  ;;  %828 = vset.pattern.permute.xlu0 %v854_v2  ;;  %v570_v17 = vld [vmem:[%s1171_s5 + $0xe0] sm:$0xff] }
  0x16   :  { %751 = vmatprep.subr.bf16.mxu0 %v856_v8  ;;  %v782_v19 = vpack.c.bf16 %v571_v18, %v570_v17 }
  0x19   :  { %753 = vmatpush3.bf16.msra.mxu0 %v752_v20  ;;  %v572_v20 = vld [vmem:[%s1171_s5 + $0xf0] sm:$0xff] }
  0x1a   :  { %754 = vmatprep.subr.bf16.mxu0 %v856_v8  ;;  %v785_v22 = vpack.c.bf16 %v573_v21, %v572_v20 }
  0x1d   :  { %756 = vmatpush3.bf16.msra.mxu0 %v755_v23  ;;  %v353_v23 = vld [vmem:[%s1172_s6] sm:$0xff] }
  0x1e   :  { %757 = vmatprep.subr.bf16.mxu0 %v856_v8 }
  0x21   :  { %759 = vmatpush3.bf16.msra.mxu0 %v758_v26  ;;  %v788_v26 = vpack.c.bf16 %v354_v24, %v353_v23 }
  0x22   :  { %760 = vmatprep.subr.bf16.mxu0 %v856_v8 }
  0x25   :  { %762 = vmatpush3.bf16.msra.mxu0 %v761_v29  ;;  %v557_v29 = vld [vmem:[%s1170_s4 + $0x3] ss:$0 sm:$0xff] }
  0x26   :  { %787 = vmatprep.subr.bf16.mxu0 %v856_v8 }
  0x81   :  { %v121_v31 = vpop.permute.xlu0 %120  ;;  %v147_v38 = vpop.permute.xlu1 %146 }
  0x82   :  { %v127_v33 = vmul.f32 %v553_v30, %v121_v31  ;;  %v153_v42 = vmul.f32 %v556_v37, %v147_v38  ;;  %v550_v38 = vld [vmem:[%s1170_s4 + $0x1] ss:$0 sm:$0xff] }
  0x84   :  { %v132_v40 = vadd.f32 %v554_v35, %v127_v33  ;;  %v549_v35 = vld [vmem:[%s1169_s3 + $0x3] ss:$0 sm:$0xff] }
  0x86   :  { %v136_v39 = vpop.permute.xlu0 %135  ;;  %v39_v46 = vpop.permute.xlu1 %38 }
  0x87   :  { %v142_v41 = vmul.f32 %v555_v36, %v136_v39  ;;  %v45_v48 = vmul.f32 %v545_v47, %v39_v46  ;;  %v551_v39 = vld [vmem:[%s1169_s3 + $0x4] ss:$0 sm:$0xff] }
  0x89   :  { %v143_v43 = vadd.f32 %v142_v41, %v132_v40  ;;  %v50_v52 = vadd.f32 %v546_v49, %v45_v48 }
  0x8b   :  { %v154_v44 = vadd.f32 %v153_v42, %v143_v43  ;;  %v54_v51 = vpop.permute.xlu1 %53  ;;  %v65_v55 = vpop.permute.xlu0 %64  ;;  %v552_v43 = vld [vmem:[%s1169_s3 + $0x5] ss:$0 sm:$0xff]  ;;  %s537_s3 = sshll.u32 %s860_s20, 4  ;;  %s538_s3 = int_to_ptr.vmem [resolvable:$true] %s537_s3 }
  0x8c   :  { %v60_v53 = vmul.f32 %v547_v50, %v54_v51  ;;  %v71_v57 = vmul.f32 %v548_v54, %v65_v55  ;;  %v357_v51 = vld [vmem:[%s1172_s6 + $0x20] sm:$0xff]  ;;  %v359_v54 = vld [vmem:[%s1172_s6 + $0x30] sm:$0xff]  ;;  %s829_s4 = scalar_lea.vmem %s538_s3, 128  ;;  %p834_p1 = scmp.lt.s32.totalorder %s538_s3, %s538_s3 }
  0x8d   :  { %v155_v45 = vmax.f32 %v154_v44, 0.0  ;;  %p830_p0 = scmp.ne.s32.totalorder %s538_s3, %s829_s4  ;;  %p835_p2 = scmp.lt.s32.totalorder %s829_s4, %s829_s4 }
  0x8e   :  { %v61_v56 = vadd.f32 %v60_v53, %v50_v52  ;;  %v358_v52 = vld [vmem:[%s1172_s6 + $0x28] sm:$0xff] }
  0x8f   :  { %157 = vrot.lane.b32.xlu1 %v155_v45, %s859_s1  ;;  %v794_v53 = vpack.c.bf16 %v358_v52, %v357_v51  ;;  %p836_p3 = por %p835_p2, %p834_p1 }
  0x90   :  { %v72_v58 = vadd.f32 %v71_v57, %v61_v56  ;;  %v95_v40 = vpop.permute.xlu0 %94  ;;  %v441_v56 = vld [vmem:[%s1173_s7] sm:$0xff]  ;;  %v442_v57 = vld [vmem:[%s1173_s7 + $0x8] sm:$0xff] }
  0x91   :  { %v101_v42 = vmul.f32 %v551_v39, %v95_v40  ;;  %p837_p4 = pnand %p836_p3, %p830_p0 }
  0x92   :  { %v73_v59 = vmax.f32 %v72_v58, 0.0  ;;  %v443_v58 = vld [vmem:[%s1173_s7 + $0x10] sm:$0xff] }
  0x93   :  { %79 = vperm.xlu1 %825, %v74_v34  }
  0x97   :  { %827 = vset.pattern.permute.xlu1 %v854_v2  ;;  %v561_v2 = vld [vmem:[%s1171_s5 + $0x98] sm:$0xff] }
  0x98   :  { %105 = vperm.xlu1 %827, %v74_v34   ;;  %v767_v3 = vpack.c.bf16 %v561_v2, %v560_v0 }
  0x9a   :  { %768 = vmatpush3.bf16.msra.mxu1 %v767_v3 }
  0x9b   :  { %769 = vmatprep.subr.bf16.mxu1 %v856_v8 }
  0x9e   :  { %771 = vmatpush3.bf16.msra.mxu1 %v770_v6  ;;  %v806_v6 = vpack.c.bf16 %v446_v5, %v445_v4 }
  0x9f   :  { %772 = vmatprep.subr.bf16.mxu1 %v856_v8 }
  0xa2   :  { %774 = vmatpush3.bf16.msra.mxu1 %v773_v10  ;;  %v809_v10 = vpack.c.bf16 %v448_v9, %v447_v7 }
  0xa3   :  { %775 = vmatprep.subr.bf16.mxu1 %v856_v8 }
  0xa6   :  { %777 = vmatpush3.bf16.msra.mxu1 %v776_v13 }
  0xa7   :  { %778 = vmatprep.subr.bf16.mxu1 %v856_v8 }
  0xaa   :  { %780 = vmatpush3.bf16.msra.mxu1 %v779_v16 }
  0xab   :  { %781 = vmatprep.subr.bf16.mxu1 %v856_v8 }
  0xae   :  { %783 = vmatpush3.bf16.msra.mxu1 %v782_v19 }
  0xaf   :  { %784 = vmatprep.subr.bf16.mxu1 %v856_v8 }
  0xb2   :  { %786 = vmatpush3.bf16.msra.mxu1 %v785_v22 }
  0xb3   :  { %799 = vmatprep.subr.bf16.mxu1 %v856_v8 }
 0x101   :  { %v158_v60 = vpop.permute.xlu1 %157 }
 0x102   :  { %v161_v61 = vsel %vm160_vm1, %v73_v59, %v158_v60  ;;  %v800_v59 = vpack.c.bf16 %v442_v57, %v441_v56  ;;  %v444_v60 = vld [vmem:[%s1173_s7 + $0x18] sm:$0xff] }
 0x103   :  { %664 = vmatmul.mubr.f32.vlgmr.msra.gmra.mrb[0].mxu0 %v161_v61  ;;  %v803_v61 = vpack.c.bf16 %v444_v60, %v443_v58 }
 0x104   :  { %717 = vmatprep.mubr.msk.f32.mxu0 %vm857_vm0, %v858_v32  ;;  %789 = vmatpush3.bf16.msra.mxu0 %v788_v26 }
 0x105   :  { %790 = vmatprep.subr.bf16.mxu0 %v856_v8 }
 0x108   :  { %792 = vmatpush3.bf16.msra.mxu0 %v791_v28 }
 0x109   :  { %793 = vmatprep.subr.bf16.mxu0 %v856_v8 }
 0x10c   :  { %795 = vmatpush3.bf16.msra.mxu0 %v794_v53 }
 0x10d   :  { %796 = vmatprep.subr.bf16.mxu0 %v856_v8 }
 0x112   :  { %v80_v36 = vpop.permute.xlu1 %79 }
 0x113   :  { %v86_v37 = vmul.f32 %v549_v35, %v80_v36 }
 0x115   :  { %v91_v41 = vadd.f32 %v550_v38, %v86_v37 }
 0x117   :  { %v106_v44 = vpop.permute.xlu1 %105  ;;  %v102_v45 = vadd.f32 %v101_v42, %v91_v41 }
 0x118   :  { %v112_v46 = vmul.f32 %v552_v43, %v106_v44 }
 0x11a   :  { %v113_v47 = vadd.f32 %v112_v46, %v102_v45 }
 0x11c   :  { %v114_v48 = vmax.f32 %v113_v47, 0.0 }
 0x1d6   :  { %v249_v30 = vpop.f32.mrb[0].mxu0 }
 0x1d7   :  { %v250_v31 = vadd.f32 %v557_v29, %v249_v30  ;;  %v665_v33 = vpop.f32.mrb[1].mxu0 }
 0x1d9   :  { %v253_v34 = vmax.f32 %v250_v31, 0.0 }
 0x1db   :  { %255 = vrot.lane.b32.xlu1 %v253_v34, %s859_s1 }
 0x24d   :  { %v256_v49 = vpop.permute.xlu1 %255 }
 0x24e   :  { %v258_v50 = vsel %vm160_vm1, %v114_v48, %v256_v49 }
 0x24f   :  { %699 = vmatmul.mubr.f32.vlgmr.msra.gmra.mrb[0].mxu1 %v258_v50 }
 0x250   :  { %736 = vmatprep.mubr.msk.f32.mxu1 %vm857_vm0, %v858_v32  ;;  %v360_v32 = vld [vmem:[%s1172_s6 + $0x38] sm:$0xff]  ;;  %801 = vmatpush3.bf16.msra.mxu1 %v800_v59 }
 0x251   :  { %v797_v55 = vpack.c.bf16 %v360_v32, %v359_v54  ;;  %802 = vmatprep.subr.bf16.mxu1 %v856_v8 }
 0x253   :  { %798 = vmatpush3.bf16.msra.mxu0 %v797_v55 }
 0x254   :  { %804 = vmatpush3.bf16.msra.mxu1 %v803_v61 }
 0x255   :  { %805 = vmatprep.subr.bf16.mxu1 %v856_v8 }
 0x258   :  { %807 = vmatpush3.bf16.msra.mxu1 %v806_v6 }
 0x259   :  { %808 = vmatprep.subr.bf16.mxu1 %v856_v8  ;;  %v577_v8 = vld [vmem:[%s1174_s8] ss:$0 sm:$0xff] }
 0x25c   :  { %810 = vmatpush3.bf16.msra.mxu1 %v809_v10 }
 0x322   :  { %v347_v63 = vpop.f32.mrb[0].mxu1 }
 0x323   :  { %v348_v0 = vadd.f32 %v574_v62, %v347_v63  ;;  %v700_v1 = vpop.f32.mrb[1].mxu1 }
 0x325   :  { %v351_v2 = vmul.f32 0.01, %v348_v0 }
 0x327   :  { %v352_v3 = vmax.f32 %v348_v0, %v351_v2 }
 0x329   :  { %718 = vmatmul.mubr.msk.f32.vlgmr.msra.gmra.mrb[2].mxu0 %vm160_vm1, %v352_v3 }
 0x3fc   :  { %v435_v12 = vpop.f32.mrb[2].mxu0 }
 0x3fd   :  { %v436_v13 = vadd.f32 %v575_v11, %v435_v12  ;;  %v719_v14 = vpop.f32.mrb[3].mxu0 }
 0x3ff   :  { %v439_v15 = vmul.f32 0.01, %v436_v13 }
 0x401   :  { %v440_v16 = vmax.f32 %v436_v13, %v439_v15 }
 0x403   :  { %737 = vmatmul.mubr.msk.f32.vlgmr.msra.gmra.mrb[2].mxu1 %vm160_vm1, %v440_v16 }
 0x4d6   :  { %v525_v17 = vpop.f32.mrb[2].mxu1 }
 0x4d7   :  { %v526_v18 = vadd.f32 %v577_v8, %v525_v17  ;;  %v738_v19 = vpop.f32.mrb[3].mxu1 }
 0x4d9   :  { %530 = vst.msk [vmem:[#allocation2] sm:$0xff] %vm529_vm2, %v526_v18 }
 0x4da   :  { %840 = shalt.err (!%p837_p4)
}
 0x4db   :  { %s841_s22 = scalar_lea.hbm %s1175_s9, 128 }
 0x4dc   :  { %p842_p5 = scmp.ne.s32.totalorder %s1175_s9, %s841_s22  ;;  %p845_p6 = scmp.lt.u32.totalorder %s841_s22, %s1175_s9 }
 0x4de   :  { %p847_p7 = pnand %p845_p6, %p842_p5 }
 0x4e0   :  { %850 = shalt.err (!%p847_p7)
}
 0x4e1   :  { %540 = dma.vmem_to_hbm [thread:$0]  %s538_s3, 128, %s1175_s9, [#allocation3]  }
 0x4e2   :  { %851 = dma.done.wait [#allocation3], 128  }
 0x4e3   :  { %852 = vsyncadd [#allocation3], 4294967168 }
 0x4e4   :  { %544 = vsyncpa [#allocation3], 1 }

</bundles_post_ra>
